<compile_context>
chip_gen: v6e
topology: v6e:2x2x1
jax: 0.10.0
libtpu: 0.0.40
codegen_flags: <defaults>
</compile_context>

<pallas_src>
import jax
import jax.numpy as jnp
from jax.experimental import pallas as pl
from jax.experimental.pallas import tpu as pltpu


def _value_net_kernel(x_ref, w1_ref, b1_ref, w2_ref, b2_ref,
                      w3_ref, b3_ref, w4_ref, b4_ref, o_ref):
    # Layer 1: ReLU(x @ W1 + b1)   (bf16 operands, f32 MXU accumulation)
    h = jnp.dot(x_ref[...], w1_ref[...], preferred_element_type=jnp.float32)
    h = jnp.maximum(h + b1_ref[...], 0.0)
    # Layer 2: ReLU(h @ W2 + b2)
    h = jnp.dot(h.astype(jnp.bfloat16), w2_ref[...],
                preferred_element_type=jnp.float32)
    h = jnp.maximum(h + b2_ref[...], 0.0)
    # Layer 3: ReLU(h @ W3 + b3)
    h = jnp.dot(h.astype(jnp.bfloat16), w3_ref[...],
                preferred_element_type=jnp.float32)
    h = jnp.maximum(h + b3_ref[...], 0.0)
    # Output layer (64 -> 1): VPU multiply + XLU lane reduction instead of an
    # N=1 MXU matmul; scalar bias comes from SMEM.
    val = jnp.sum(h * w4_ref[...], axis=-1, keepdims=True) + b4_ref[0]
    o_ref[...] = val.astype(o_ref.dtype)


def value_network_forward(x, params, *, tm=1024):
    """x: (B, state_dim) float32. params: dict of weights/biases. Returns (B, 1) f32."""
    B, S = x.shape
    H = params["w1"].shape[1]

    # Batch tile: as large as possible, multiple of 8, capped at `tm`.
    tm_eff = max(8, min(tm, -(-B // 8) * 8))
    grid_b = -(-B // tm_eff)
    B_pad = grid_b * tm_eff

    # bf16 operands for the MXU (f32 accumulation happens inside the kernel).
    x_bf = x.astype(jnp.bfloat16)
    if B_pad != B:
        x_bf = jnp.pad(x_bf, ((0, B_pad - B), (0, 0)))
    w1 = params["w1"].astype(jnp.bfloat16)
    w2 = params["w2"].astype(jnp.bfloat16)
    w3 = params["w3"].astype(jnp.bfloat16)
    b1, b2, b3 = params["b1"], params["b2"], params["b3"]
    w4_row = params["w4"].reshape(1, H).astype(jnp.float32)   # (1, 64) row for the VPU
    b4 = params["b4"].reshape(1).astype(jnp.float32)          # scalar, lives in SMEM

    const = lambda shape: pl.BlockSpec(shape, lambda i: (0,) * len(shape))

    out = pl.pallas_call(
        _value_net_kernel,
        out_shape=jax.ShapeDtypeStruct((B_pad, 1), jnp.float32),
        grid=(grid_b,),
        in_specs=[
            pl.BlockSpec((tm_eff, S), lambda i: (i, 0)),          # x, batch-tiled
            const(w1.shape), const(b1.shape),                     # resident weights
            const(w2.shape), const(b2.shape),
            const(w3.shape), const(b3.shape),
            const(w4_row.shape),
            pl.BlockSpec(memory_space=pltpu.MemorySpace.SMEM),    # b4 scalar
        ],
        out_specs=pl.BlockSpec((tm_eff, 1), lambda i: (i, 0)),
        compiler_params=pltpu.CompilerParams(
            dimension_semantics=("parallel",)),                   # v7x: both TCs
    )(x_bf, w1, b1, w2, b2, w3, b3, w4_row, b4)

    return out[:B] if B_pad != B else out


def init_params(key, state_dim, hidden=64):
    """Deterministic synthetic init (mimics nn.Linear uniform(-1/sqrt(fan_in), +))."""
    def linear(k, fan_in, fan_out):
        k_w, k_b = jax.random.split(k)
        bound = 1.0 / jnp.sqrt(fan_in)
        w = jax.random.uniform(k_w, (fan_in, fan_out), jnp.float32, -bound, bound)
        b = jax.random.uniform(k_b, (1, fan_out), jnp.float32, -bound, bound)
        return w, b

    k1, k2, k3, k4 = jax.random.split(key, 4)
    w1, b1 = linear(k1, state_dim, hidden)
    w2, b2 = linear(k2, hidden, hidden)
    w3, b3 = linear(k3, hidden, hidden)
    w4, b4 = linear(k4, hidden, 1)
    return dict(w1=w1, b1=b1, w2=w2, b2=b2, w3=w3, b3=b3,
                w4=w4, b4=b4.reshape(1))


def value_network_ref(x, p):
    """Pure-JAX reference with matching bf16-operand / f32-accumulate numerics."""
    bf16, f32 = jnp.bfloat16, jnp.float32
    h = jnp.maximum(jnp.dot(x.astype(bf16), p["w1"].astype(bf16),
                            preferred_element_type=f32) + p["b1"], 0.0)
    h = jnp.maximum(jnp.dot(h.astype(bf16), p["w2"].astype(bf16),
                            preferred_element_type=f32) + p["b2"], 0.0)
    h = jnp.maximum(jnp.dot(h.astype(bf16), p["w3"].astype(bf16),
                            preferred_element_type=f32) + p["b3"], 0.0)
    return h @ p["w4"] + p["b4"]


if __name__ == "__main__":
    key = jax.random.PRNGKey(0)
    k_params, k_x = jax.random.split(key)

    # Small shapes; batch=60 with tm=16 exercises a 4-step grid plus the
    # padded final tile (60 -> 64) and the un-padding slice.
    batch, state_dim = 60, 16
    params = init_params(k_params, state_dim)
    x = jax.random.normal(k_x, (batch, state_dim), jnp.float32)

    out = value_network_forward(x, params, tm=16)
    out = jax.block_until_ready(out)

    ref = value_network_ref(x, params)
    assert out.shape == (batch, 1), out.shape
    assert jnp.allclose(out, ref, atol=1e-2, rtol=1e-2), \
        float(jnp.max(jnp.abs(out - ref)))

    # Also exercise the default (single large tile) path.
    out2 = jax.block_until_ready(value_network_forward(x, params))
    assert jnp.allclose(out2, ref, atol=1e-2, rtol=1e-2)

    print("KERNEL_OK")
</pallas_src>

<mosaic_0001>
module attributes {stable_mosaic.version = 11 : i64} {
  func.func @_value_net_kernel(%arg0: i32, %arg1: memref<16x16xbf16, #tpu.memory_space<vmem>>, %arg2: memref<16x64xbf16, #tpu.memory_space<vmem>>, %arg3: memref<1x64xf32, #tpu.memory_space<vmem>>, %arg4: memref<64x64xbf16, #tpu.memory_space<vmem>>, %arg5: memref<1x64xf32, #tpu.memory_space<vmem>>, %arg6: memref<64x64xbf16, #tpu.memory_space<vmem>>, %arg7: memref<1x64xf32, #tpu.memory_space<vmem>>, %arg8: memref<1x64xf32, #tpu.memory_space<vmem>>, %arg9: memref<1xf32, #tpu.memory_space<smem>>, %arg10: memref<16x1xf32, #tpu.memory_space<vmem>>) attributes {dimension_semantics = [#tpu.dimension_semantics<parallel>], iteration_bounds = array<i64: 4>, scalar_prefetch = 0 : i64, scratch_operands = 0 : i64, tpu.core_type = #tpu.core_type<tc>, window_params = [{transform_indices = @transform_0, window_bounds = array<i64: 16, 16>}, {pipeline_mode = #tpu.pipeline_mode<synchronous>, transform_indices = @transform_1, window_bounds = array<i64: 16, 64>}, {pipeline_mode = #tpu.pipeline_mode<synchronous>, transform_indices = @transform_2, window_bounds = array<i64: 1, 64>}, {pipeline_mode = #tpu.pipeline_mode<synchronous>, transform_indices = @transform_3, window_bounds = array<i64: 64, 64>}, {pipeline_mode = #tpu.pipeline_mode<synchronous>, transform_indices = @transform_4, window_bounds = array<i64: 1, 64>}, {pipeline_mode = #tpu.pipeline_mode<synchronous>, transform_indices = @transform_5, window_bounds = array<i64: 64, 64>}, {pipeline_mode = #tpu.pipeline_mode<synchronous>, transform_indices = @transform_6, window_bounds = array<i64: 1, 64>}, {pipeline_mode = #tpu.pipeline_mode<synchronous>, transform_indices = @transform_7, window_bounds = array<i64: 1, 64>}, {transform_indices = @transform_8, window_bounds = array<i64: 1>}, {transform_indices = @transform_9, window_bounds = array<i64: 16, 1>}]} {
    %c0 = arith.constant 0 : index
    %c0_0 = arith.constant 0 : index
    %0 = vector.load %arg1[%c0, %c0_0] : memref<16x16xbf16, #tpu.memory_space<vmem>>, vector<16x16xbf16>
    %c0_1 = arith.constant 0 : index
    %c0_2 = arith.constant 0 : index
    %1 = vector.load %arg2[%c0_1, %c0_2] : memref<16x64xbf16, #tpu.memory_space<vmem>>, vector<16x64xbf16>
    %cst = arith.constant dense<0.000000e+00> : vector<16x64xf32>
    %2 = tpu.matmul %0, %1, %cst {dimension_numbers = #tpu.dot_dimension_numbers<[1], [0], [0], [1], [0, 0, 1, 1], [], []>} : vector<16x16xbf16>, vector<16x64xbf16>, vector<16x64xf32> -> vector<16x64xf32>
    %c0_3 = arith.constant 0 : index
    %c0_4 = arith.constant 0 : index
    %3 = vector.load %arg3[%c0_3, %c0_4] : memref<1x64xf32, #tpu.memory_space<vmem>>, vector<1x64xf32>
    %4 = vector.broadcast %3 : vector<1x64xf32> to vector<16x64xf32>
    %5 = arith.addf %2, %4 : vector<16x64xf32>
    %cst_5 = arith.constant 0.000000e+00 : f32
    %6 = vector.broadcast %cst_5 : f32 to vector<16x64xf32>
    %7 = arith.maximumf %5, %6 : vector<16x64xf32>
    %8 = arith.truncf %7 : vector<16x64xf32> to vector<16x64xbf16>
    %c0_6 = arith.constant 0 : index
    %c0_7 = arith.constant 0 : index
    %9 = vector.load %arg4[%c0_6, %c0_7] : memref<64x64xbf16, #tpu.memory_space<vmem>>, vector<64x64xbf16>
    %cst_8 = arith.constant dense<0.000000e+00> : vector<16x64xf32>
    %10 = tpu.matmul %8, %9, %cst_8 {dimension_numbers = #tpu.dot_dimension_numbers<[1], [0], [0], [1], [0, 0, 1, 1], [], []>} : vector<16x64xbf16>, vector<64x64xbf16>, vector<16x64xf32> -> vector<16x64xf32>
    %c0_9 = arith.constant 0 : index
    %c0_10 = arith.constant 0 : index
    %11 = vector.load %arg5[%c0_9, %c0_10] : memref<1x64xf32, #tpu.memory_space<vmem>>, vector<1x64xf32>
    %12 = vector.broadcast %11 : vector<1x64xf32> to vector<16x64xf32>
    %13 = arith.addf %10, %12 : vector<16x64xf32>
    %cst_11 = arith.constant 0.000000e+00 : f32
    %14 = vector.broadcast %cst_11 : f32 to vector<16x64xf32>
    %15 = arith.maximumf %13, %14 : vector<16x64xf32>
    %16 = arith.truncf %15 : vector<16x64xf32> to vector<16x64xbf16>
    %c0_12 = arith.constant 0 : index
    %c0_13 = arith.constant 0 : index
    %17 = vector.load %arg6[%c0_12, %c0_13] : memref<64x64xbf16, #tpu.memory_space<vmem>>, vector<64x64xbf16>
    %cst_14 = arith.constant dense<0.000000e+00> : vector<16x64xf32>
    %18 = tpu.matmul %16, %17, %cst_14 {dimension_numbers = #tpu.dot_dimension_numbers<[1], [0], [0], [1], [0, 0, 1, 1], [], []>} : vector<16x64xbf16>, vector<64x64xbf16>, vector<16x64xf32> -> vector<16x64xf32>
    %c0_15 = arith.constant 0 : index
    %c0_16 = arith.constant 0 : index
    %19 = vector.load %arg7[%c0_15, %c0_16] : memref<1x64xf32, #tpu.memory_space<vmem>>, vector<1x64xf32>
    %20 = vector.broadcast %19 : vector<1x64xf32> to vector<16x64xf32>
    %21 = arith.addf %18, %20 : vector<16x64xf32>
    %cst_17 = arith.constant 0.000000e+00 : f32
    %22 = vector.broadcast %cst_17 : f32 to vector<16x64xf32>
    %23 = arith.maximumf %21, %22 : vector<16x64xf32>
    %c0_18 = arith.constant 0 : index
    %c0_19 = arith.constant 0 : index
    %24 = vector.load %arg8[%c0_18, %c0_19] : memref<1x64xf32, #tpu.memory_space<vmem>>, vector<1x64xf32>
    %25 = vector.broadcast %24 : vector<1x64xf32> to vector<16x64xf32>
    %26 = arith.mulf %23, %25 : vector<16x64xf32>
    %cst_20 = arith.constant dense<0.000000e+00> : vector<16xf32>
    %27 = vector.multi_reduction <add>, %26, %cst_20 [1] : vector<16x64xf32> to vector<16xf32>
    %28 = vector.shape_cast %27 : vector<16xf32> to vector<16x1xf32>
    %c0_21 = arith.constant 0 : index
    %29 = memref.load %arg9[%c0_21] : memref<1xf32, #tpu.memory_space<smem>>
    %30 = vector.broadcast %29 : f32 to vector<16x1xf32>
    %31 = arith.addf %28, %30 : vector<16x1xf32>
    %c0_22 = arith.constant 0 : index
    %c0_23 = arith.constant 0 : index
    %32 = vector.load %arg10[%c0_22, %c0_23] : memref<16x1xf32, #tpu.memory_space<vmem>>, vector<16x1xf32>
    tpu.vector_store %arg10[%c0_22, %c0_23], %31 {strides = array<i32>} : memref<16x1xf32, #tpu.memory_space<vmem>>, vector<16x1xf32>,
    return
  }
  func.func @transform_0(%arg0: i32) -> (i32, i32) {
    %c0_i32 = arith.constant 0 : i32
    %c0_i32_0 = arith.constant 0 : i32
    return %arg0, %c0_i32 : i32, i32
  }
  func.func @transform_1(%arg0: i32) -> (i32, i32) {
    %c0_i32 = arith.constant 0 : i32
    %c0_i32_0 = arith.constant 0 : i32
    %c0_i32_1 = arith.constant 0 : i32
    return %c0_i32, %c0_i32_0 : i32, i32
  }
  func.func @transform_2(%arg0: i32) -> (i32, i32) {
    %c0_i32 = arith.constant 0 : i32
    %c0_i32_0 = arith.constant 0 : i32
    %c0_i32_1 = arith.constant 0 : i32
    return %c0_i32, %c0_i32_0 : i32, i32
  }
  func.func @transform_3(%arg0: i32) -> (i32, i32) {
    %c0_i32 = arith.constant 0 : i32
    %c0_i32_0 = arith.constant 0 : i32
    %c0_i32_1 = arith.constant 0 : i32
    return %c0_i32, %c0_i32_0 : i32, i32
  }
  func.func @transform_4(%arg0: i32) -> (i32, i32) {
    %c0_i32 = arith.constant 0 : i32
    %c0_i32_0 = arith.constant 0 : i32
    %c0_i32_1 = arith.constant 0 : i32
    return %c0_i32, %c0_i32_0 : i32, i32
  }
  func.func @transform_5(%arg0: i32) -> (i32, i32) {
    %c0_i32 = arith.constant 0 : i32
    %c0_i32_0 = arith.constant 0 : i32
    %c0_i32_1 = arith.constant 0 : i32
    return %c0_i32, %c0_i32_0 : i32, i32
  }
  func.func @transform_6(%arg0: i32) -> (i32, i32) {
    %c0_i32 = arith.constant 0 : i32
    %c0_i32_0 = arith.constant 0 : i32
    %c0_i32_1 = arith.constant 0 : i32
    return %c0_i32, %c0_i32_0 : i32, i32
  }
  func.func @transform_7(%arg0: i32) -> (i32, i32) {
    %c0_i32 = arith.constant 0 : i32
    %c0_i32_0 = arith.constant 0 : i32
    %c0_i32_1 = arith.constant 0 : i32
    return %c0_i32, %c0_i32_0 : i32, i32
  }
  func.func @transform_8(%arg0: i32) -> i32 {
    %c0_i32 = arith.constant 0 : i32
    %c0_i32_0 = arith.constant 0 : i32
    return %c0_i32 : i32
  }
  func.func @transform_9(%arg0: i32) -> (i32, i32) {
    %c0_i32 = arith.constant 0 : i32
    %c0_i32_0 = arith.constant 0 : i32
    return %arg0, %c0_i32 : i32, i32
  }
}

</mosaic_0001>

<bundles_post_ra>
// kernel: tpu_custom_call.1
= control target key start
LH: loop header
LB: loop body
LE: loop exit
PB: predicated region body
PF: predicated region fallthrough
CT: control target
= control target key end

     0   :  { %s962_s0 = inlined_call_operand.vmem [shape: bf16[64,16], index: 0, kind: input, shape index: {}]   ;;  %s963_s1 = inlined_call_operand.vmem [shape: bf16[16,64], index: 1, kind: input, shape index: {}]   ;;  %s964_s2 = inlined_call_operand.vmem [shape: f32[1,64], index: 2, kind: input, shape index: {}]   ;;  %s965_s3 = inlined_call_operand.vmem [shape: bf16[64,64], index: 3, kind: input, shape index: {}]   ;;  %s966_s4 = inlined_call_operand.vmem [shape: f32[1,64], index: 4, kind: input, shape index: {}]   ;;  %s967_s5 = inlined_call_operand.hbm [shape: bf16[64,64], index: 5, kind: input, shape index: {}]   ;;  %s968_s6 = inlined_call_operand.vmem [shape: f32[1,64], index: 6, kind: input, shape index: {}]   ;;  %s969_s7 = inlined_call_operand.vmem [shape: f32[1,64], index: 7, kind: input, shape index: {}]   ;;  %s970_s8 = inlined_call_operand.<no memory space> [shape: f32[1], index: 8, kind: input, shape index: {}]   ;;  %s971_s9 = inlined_call_operand.vmem [shape: f32[64,1], index: 9, kind: output, shape index: {}]  }
   0x1   :  { %14 = sst [smem:[#allocation2]] %s970_s8 }
   0x2   :  { %15 = vsyncpa [#allocation4], 0  ;;  %s886_s11 = smov 0  }
   0x3 LB: > { %s685_s12 = sadd.s32 4294967295, %s826_s11   ;;  %p687_p0 = scmp.ge.s32.totalorder %s826_s11, 1  ;;  %s826_s11 = sphi %s886_s11, %s21_s11  }
   0x4   : > { %p246_p1 = scmp.lt.s32.totalorder %s826_s11, 5  ;;  %s828_s13 = smov [#allocation3]  }
   0x5   : > { %s270_s14 = sshll.u32 %s828_s13, 4  ;;  %p898_p3 = scmp.eq.s32.totalorder %s685_s12, 0  ;;  %s271_s14 = int_to_ptr.vmem [resolvable:$true] %s270_s14 }
   0x6   : > { %p894_p2 = pnand %p687_p0, %p246_p1  ;;  %s801_s16 = scalar_lea.vmem %s271_s14, 512 }
   0x7   : > { %p802_p7 = scmp.ne.s32.totalorder %s271_s14, %s801_s16  ;;  %p809_p10 = scmp.lt.s32.totalorder %s271_s14, %s271_s14 }
   0x8   : > { %p761_p4 = pneg %p894_p2  ;;  %p810_p11 = scmp.lt.s32.totalorder %s801_s16, %s801_s16 }
   0xa   : > { %p762_p5 = pnand %p898_p3, %p761_p4  ;;  %p811_p12 = por %p810_p11, %p809_p10 }
   0xc   : > { %p792_p6 = pneg %p762_p5 }
   0xe   : > { %p804_p8 = pnand %p802_p7, %p792_p6 }
  0x10   : > { %p805_p9 = pneg %p804_p8 }
  0x12   : > { %p812_p13 = pnand %p811_p12, %p805_p9 }
  0x14   : > { %815 = shalt.err (!%p812_p13)
}
  0x15   : > { %s829_s17 = smov 64   ;;  %s830_s18 = smov 4  }
  0x16   : > { %764 = dma.hbm_to_vmem [thread:$0]  (!%p762_p5), %s967_s5, 512, %s271_s14, [#allocation4], %s829_s17, %s829_s17, %s830_s18  }
  0x17   : > { %304 = sbr.rel (%p894_p2) target bundleno = 787 (0x313), region = 56 }
  0x1c   : > { %821 = dma.done.wait (%p898_p3), [#allocation4], 512  }
  0x1d   : > { %823 = vsyncadd (%p898_p3), [#allocation4], 4294966784  ;;  %s692_s21 = sshll.u32 %s685_s12, 1  ;;  %v831_v0 = vmov 0.0   ;;  %vm832_vm0 = vmmov 0   ;;  %v780_v1 = vld [vmem:[%s963_s1] sm:$0xff]  }
  0x1e   : > { %727 = vmatprep.subr.bf16.mxu0 %v831_v0  ;;  %729 = vmatprep.mubr.msk.bf16.mxu0 %vm832_vm0, %v831_v0  ;;  %p341_p0 = scmp.lt.s32.totalorder %s692_s21, 7  ;;  %vm375_vm1 = vcmask 130048   ;;  %v782_v3 = vld [vmem:[%s965_s3 + $0x18] sm:$0xff]   ;;  %v783_v4 = vld [vmem:[%s965_s3 + $0x10] sm:$0xff]   ;;  %v784_v5 = vld [vmem:[%s965_s3 + $0x8] sm:$0xff]   ;;  %vm462_vm2 = vcmask 523264  }
  0x1f   : > { %733 = vmatprep.subr.bf16.mxu1 %v831_v0  ;;  %741 = vmatprep.mubr.msk.bf16.mxu1 %vm832_vm0, %v831_v0  ;;  %v785_v6 = vld [vmem:[%s965_s3] sm:$0xff]   ;;  %v786_v7 = vld [vmem:[#allocation3 + $0x18] sm:$0xff]   ;;  %v787_v18 = vld [vmem:[#allocation3 + $0x10] sm:$0xff]   ;;  %s610_s24 = sld [smem:[#allocation2]]  ;;  %vm614_vm3 = vcmask 7168  }
  0x20   : > { %s975_s21 = smov (!%p341_p0, %s692_s21), 7  ;;  %728 = vmatpush3.bf16.msra.mxu0 %v780_v1  ;;  %734 = vmatpush3.bf16.msra.mxu1 %v782_v3  ;;  %v696_v8 = vld [vmem:[%s964_s2] ss:$0 sm:$0xff]  ;;  %v788_v19 = vld [vmem:[#allocation3 + $0x8] sm:$0xff]  }
  0x21   : > { %s693_s22 = sshll.u32 %s975_s21, 2  ;;  %745 = vmatprep.subr.bf16.mxu0 %v831_v0  ;;  %735 = vmatprep.subr.bf16.mxu1 %v831_v0  ;;  %v789_v20 = vld [vmem:[#allocation3] sm:$0xff]  }
  0x22   : > { %s344_s25 = scalar_lea.vmem %s962_s0, %s693_s22  ;;  %v700_v21 = vld [vmem:[%s966_s4] ss:$0 sm:$0xff] }
  0x23   : > { %v781_v2 = vld [vmem:[%s344_s25] sm:$0xff]   ;;  %s695_s25 = sshll.u32 %s975_s21, 3 }
  0x24   : > { %730 = vmatmul.mubr.msk.bf16.vlgmr.msra.gmra.mxu0 %vm375_vm1, %v781_v2  ;;  %736 = vmatpush3.bf16.msra.mxu1 %v783_v4  ;;  %v706_v31 = vld [vmem:[%s968_s6] ss:$0 sm:$0xff]  ;;  %s350_s28 = scalar_lea.vmem %s971_s9, %s695_s25 }
  0x25   : > { %753 = vmatprep.mubr.msk.bf16.mxu0 %vm832_vm0, %v831_v0  ;;  %737 = vmatprep.subr.bf16.mxu1 %v831_v0  ;;  %v712_v35 = vld [vmem:[%s969_s7] ss:$0 sm:$0xff]  ;;  %v611_v45 = vstv %s610_s24 }
  0x26   : > { %746 = vmatpush3.bf16.msra.mxu0 %v786_v7 }
  0x27   : > { %747 = vmatprep.subr.bf16.mxu0 %v831_v0 }
  0x28   : > { %738 = vmatpush3.bf16.msra.mxu1 %v784_v5 }
  0x29   : > { %739 = vmatprep.subr.bf16.mxu1 %v831_v0 }
  0x2a   : > { %748 = vmatpush3.bf16.msra.mxu0 %v787_v18 }
  0x2b   : > { %749 = vmatprep.subr.bf16.mxu0 %v831_v0 }
  0x2c   : > { %740 = vmatpush3.bf16.msra.mxu1 %v785_v6 }
  0x2e   : > { %750 = vmatpush3.bf16.msra.mxu0 %v788_v19 }
  0x2f   : > { %751 = vmatprep.subr.bf16.mxu0 %v831_v0 }
  0x32   : > { %752 = vmatpush3.bf16.msra.mxu0 %v789_v20 }
  0xe4   : > { %v413_v9 = vpop.f32.mrf.mxu0 }
  0xe5   : > { %v414_v11 = vadd.f32 %v696_v8, %v413_v9 }
  0xe6   : > { %v731_v10 = vpop.f32.mrf.mxu0 }
  0xe7   : > { %v420_v15 = vmax.f32 %v414_v11, 0.0 }
  0xe8   : > { %v416_v12 = vpop.f32.mrf.mxu0 }
  0xe9   : > { %v417_v13 = vadd.f32 %v696_v8, %v416_v12 }
  0xea   : > { %v732_v14 = vpop.f32.mrf.mxu0 }
  0xeb   : > { %v421_v16 = vmax.f32 %v417_v13, 0.0 }
  0xed   : > { %v422_v17 = vpack.c.bf16 %v421_v16, %v420_v15 }
  0xef   : > { %742 = vmatmul.mubr.msk.bf16.vlgmr.msra.gmra.mxu1 %vm462_vm2, %v422_v17 }
 0x1af   : > { %v500_v22 = vpop.f32.mrf.mxu1 }
 0x1b0   : > { %v501_v24 = vadd.f32 %v700_v21, %v500_v22 }
 0x1b1   : > { %v743_v23 = vpop.f32.mrf.mxu1 }
 0x1b2   : > { %v507_v28 = vmax.f32 %v501_v24, 0.0 }
 0x1b3   : > { %v503_v25 = vpop.f32.mrf.mxu1 }
 0x1b4   : > { %v504_v26 = vadd.f32 %v700_v21, %v503_v25 }
 0x1b5   : > { %v744_v27 = vpop.f32.mrf.mxu1 }
 0x1b6   : > { %v508_v29 = vmax.f32 %v504_v26, 0.0 }
 0x1b8   : > { %v509_v30 = vpack.c.bf16 %v508_v29, %v507_v28 }
 0x1ba   : > { %754 = vmatmul.mubr.msk.bf16.vlgmr.msra.gmra.mxu0 %vm462_vm2, %v509_v30 }
 0x27a   : > { %v586_v32 = vpop.f32.mrf.mxu0 }
 0x27b   : > { %v587_v33 = vadd.f32 %v706_v31, %v586_v32 }
 0x27c   : > { %v755_v34 = vpop.f32.mrf.mxu0 }
 0x27d   : > { %v593_v36 = vmax.f32 %v587_v33, 0.0 }
 0x27e   : > { %v589_v37 = vpop.f32.mrf.mxu0 }
 0x27f   : > { %v590_v38 = vadd.f32 %v706_v31, %v589_v37  ;;  %v602_v39 = vmul.f32 %v712_v35, %v593_v36 }
 0x280   : > { %v756_v40 = vpop.f32.mrf.mxu0 }
 0x281   : > { %v594_v41 = vmax.f32 %v590_v38, 0.0  ;;  %v604_v42 = vsel %vm462_vm2, %v602_v39, 0.0 }
 0x282   : > { %605 = vadd.xlane.f32.xlu0 %v604_v42 }
 0x283   : > { %v603_v43 = vmul.f32 %v712_v35, %v594_v41 }
 0x285   : > { %v607_v44 = vsel %vm462_vm2, %v603_v43, 0.0 }
 0x286   : > { %608 = vadd.xlane.f32.xlu0 %v607_v44 }
 0x30b   : > { %v606_v46 = vpop.xlane.xlu0 %605 }
 0x30c   : > { %v612_v47 = vadd.f32 %v611_v45, %v606_v46 }
 0x30e   : > { %615 = vst.msk [vmem:[%s350_s28] sm:$0xff] %vm614_vm3, %v612_v47 }
 0x30f   : > { %v609_v48 = vpop.xlane.xlu0 %608 }
 0x310   : > { %v613_v49 = vadd.f32 %v611_v45, %v609_v48 }
 0x312   : > { %616 = vst.msk [vmem:[%s350_s28 + $0x8] sm:$0xff] %vm614_vm3, %v613_v49 }
 0x313 PF: > { %s21_s11 = sadd.s32 1, %s826_s11  }
 0x314   : > { %p18_p1 = scmp.ge.s32.totalorder %s21_s11, 6  }
 0x316   :  { %20 = sbr.rel (!%p18_p1) target bundleno = 3 (0x3), region = 91 }
 0x31b   :  { %639 = vsyncpa [#allocation4], 1 }
 0x31c   :  { %641 = vsyncpa [#allocation4 + $0x1], 1 }

</bundles_post_ra>
